<compile_context>
chip_gen: v7x
topology: tpu7x:2x2x1
jax: 0.10.0
libtpu: 0.0.40
codegen_flags: <defaults>
</compile_context>

<pallas_src>
import functools

import jax
import jax.numpy as jnp
from jax.experimental import pallas as pl
from jax.experimental.pallas import tpu as pltpu


def _round_up(x, m):
    return (x + m - 1) // m * m


def _net_kernel(n_hidden, input_dim, output_dim, x_ref, *refs):
    # refs = [W0, b0, ..., W_{n-1}, b_{n-1}, k_ones, k_xh, kpsi_out, psi_out]
    w_refs = refs[: 2 * n_hidden]
    k1_ref, kxh_ref = refs[2 * n_hidden : 2 * n_hidden + 2]
    kpsi_ref, psi_ref = refs[2 * n_hidden + 2 :]

    x = x_ref[...]                                   # (tile_b, input_dim)
    h = x
    for i in range(n_hidden):
        w = w_refs[2 * i][...]                       # (d_in, d_out)
        b = w_refs[2 * i + 1][...]                   # (1, d_out)
        h = jnp.dot(h, w, preferred_element_type=jnp.float32) + b
        h = jnp.maximum(h, 0.0)                      # ReLU

    tb = x.shape[0]
    out_pad = psi_ref.shape[1]

    # Single [x | h] block reused by both the Koopman matmul and PsiXf.
    xh = jnp.concatenate([x, h], axis=1)             # (tile_b, input_dim + h_dim)

    # KPsiXp = [1, x, h] @ K^T  ==  K^T[0,:] + [x|h] @ K^T[1:,:]   (one matmul)
    kpsi_ref[...] = k1_ref[...] + jnp.dot(
        xh, kxh_ref[...], preferred_element_type=jnp.float32
    )

    # PsiXf = [1 | x | h | 0-pad] built in registers, one unmasked lane-dense store.
    parts = [jnp.ones((tb, 1), jnp.float32), xh]
    pad = out_pad - output_dim
    if pad > 0:
        parts.append(jnp.zeros((tb, pad), jnp.float32))
    psi_ref[...] = jnp.concatenate(parts, axis=1)


def _choose_tile_b(B, tile_b_max, min_steps):
    """Pick tile_b (multiple of 8) so padding per step is < 8 rows and the
    grid has at least `min_steps` steps (megacore sharding on v7x)."""
    tile_b_max = max(8, _round_up(tile_b_max, 8))
    want_steps = min_steps if B > 8 else 1
    n_steps = max(want_steps, pl.cdiv(B, tile_b_max))
    tile_b = _round_up(pl.cdiv(B, n_steps), 8)
    b_pad = n_steps * tile_b
    return tile_b, b_pad


def net_forward(x, params, *, tile_b=2048, slice_outputs=True):
    """x: (B, input_dim) f32. params from init_params (pre-transposed / pre-padded).

    slice_outputs=False returns the (b_pad, 128)-padded buffers (padded lanes of
    KPsiXp are exact zeros, padded batch rows are garbage) and skips the
    compacting copy -- useful when the consumer can fuse the slice itself.
    """
    weights = params["weights"]
    biases = params["biases"]
    k_ones = params["k_ones"]
    k_xh = params["k_xh"]
    output_dim = params["output_dim"]

    n_hidden = len(weights)
    B, input_dim = x.shape
    out_pad = k_ones.shape[1]

    tile_b, b_pad = _choose_tile_b(B, tile_b, min_steps=2)
    if b_pad != B:
        x = jnp.pad(x, ((0, b_pad - B), (0, 0)))

    flat_params = []
    in_specs = [pl.BlockSpec((tile_b, input_dim), lambda i: (i, 0))]
    for w, b in zip(weights, biases):
        flat_params += [w, b]
        in_specs += [
            pl.BlockSpec(w.shape, lambda i: (0, 0)),   # VMEM-resident across grid
            pl.BlockSpec(b.shape, lambda i: (0, 0)),
        ]
    flat_params += [k_ones, k_xh]
    in_specs += [
        pl.BlockSpec(k_ones.shape, lambda i: (0, 0)),
        pl.BlockSpec(k_xh.shape, lambda i: (0, 0)),
    ]

    out_spec = pl.BlockSpec((tile_b, out_pad), lambda i: (i, 0))
    kernel = functools.partial(_net_kernel, n_hidden, input_dim, output_dim)

    # Double-buffered working set: 2 outputs + 1 input tile, plus resident params.
    resident = sum(int(p.size) for p in flat_params) * 4
    vmem_est = 2 * (2 * tile_b * out_pad + tile_b * input_dim) * 4 + resident
    cp = dict(dimension_semantics=("parallel",))
    if vmem_est > 16 * 2**20:  # only needed if a caller forces very large tiles (v5e default limit)
        cp["vmem_limit_bytes"] = min(2 * vmem_est, 48 * 2**20)

    kpsi, psi = pl.pallas_call(
        kernel,
        out_shape=(
            jax.ShapeDtypeStruct((b_pad, out_pad), jnp.float32),  # KPsiXp (padded)
            jax.ShapeDtypeStruct((b_pad, out_pad), jnp.float32),  # PsiXf  (padded)
        ),
        grid=(b_pad // tile_b,),
        in_specs=in_specs,
        out_specs=(out_spec, out_spec),
        compiler_params=pltpu.CompilerParams(**cp),
    )(x, *flat_params)

    if not slice_outputs:
        return {"KPsiXp": kpsi, "PsiXf": psi}
    return {"KPsiXp": kpsi[:B, :output_dim], "PsiXf": psi[:B, :output_dim]}


def init_params(key, input_dim, hl_sizes, output_dim, lane=128):
    """Torch-like uniform(+-1/sqrt(fan_in)) init; Koopman pre-transposed/split/padded."""
    weights, biases = [], []
    d_in = input_dim
    for d_out in hl_sizes:
        key, kw, kb = jax.random.split(key, 3)
        bound = 1.0 / jnp.sqrt(jnp.float32(d_in))
        weights.append(jax.random.uniform(kw, (d_in, d_out), jnp.float32, -bound, bound))
        biases.append(jax.random.uniform(kb, (1, d_out), jnp.float32, -bound, bound))
        d_in = d_out

    key, kk = jax.random.split(key)
    bound = 1.0 / jnp.sqrt(jnp.float32(output_dim))
    koopman = jax.random.uniform(kk, (output_dim, output_dim), jnp.float32, -bound, bound)

    # Hoisted out of the forward pass: transpose, zero-pad output lanes to a
    # multiple of 128, split into the "ones" row and the merged [x | h] rows.
    out_pad = _round_up(output_dim, lane)
    kT = jnp.pad(koopman.T, ((0, 0), (0, out_pad - output_dim)))
    params = dict(
        weights=weights,
        biases=biases,
        k_ones=kT[0:1, :],          # (1, out_pad)
        k_xh=kT[1:, :],             # (input_dim + h_dim, out_pad), single matmul operand
        output_dim=output_dim,
    )
    return params, koopman


def reference_forward(x, weights, biases, koopman):
    h = x
    for w, b in zip(weights, biases):
        h = jnp.maximum(h @ w + b, 0.0)
    y = jnp.concatenate([jnp.ones((x.shape[0], 1), jnp.float32), x, h], axis=1)
    return {"KPsiXp": y @ koopman.T, "PsiXf": y}


if __name__ == "__main__":
    # Small shapes consistent with the module: output_dim = 1 + input_dim + hl_sizes[-1]
    batch = 12           # not a multiple of 8 -> exercises batch padding + 2-step grid
    input_dim = 4
    hl_sizes = [32, 16]
    output_dim = 1 + input_dim + hl_sizes[-1]  # 21

    key = jax.random.PRNGKey(0)
    key, kx = jax.random.split(key)
    x = jax.random.normal(kx, (batch, input_dim), jnp.float32)

    params, koopman = init_params(key, input_dim, hl_sizes, output_dim)

    out = net_forward(x, params)
    jax.block_until_ready(out)

    ref = reference_forward(x, params["weights"], params["biases"], koopman)
    assert out["PsiXf"].shape == (batch, output_dim)
    assert out["KPsiXp"].shape == (batch, output_dim)
    assert jnp.allclose(out["PsiXf"], ref["PsiXf"], atol=1e-5, rtol=1e-5)
    assert jnp.allclose(out["KPsiXp"], ref["KPsiXp"], atol=1e-5, rtol=1e-5)

    # Second check: a batch that forces multiple non-trivial tiles + padding path.
    batch2 = 300
    key, kx2 = jax.random.split(key)
    x2 = jax.random.normal(kx2, (batch2, input_dim), jnp.float32)
    out2 = net_forward(x2, params, tile_b=128)
    jax.block_until_ready(out2)
    ref2 = reference_forward(x2, params["weights"], params["biases"], koopman)
    assert jnp.allclose(out2["PsiXf"], ref2["PsiXf"], atol=1e-5, rtol=1e-5)
    assert jnp.allclose(out2["KPsiXp"], ref2["KPsiXp"], atol=1e-5, rtol=1e-5)

    print("KERNEL_OK")
</pallas_src>

<mosaic_0001>
module attributes {stable_mosaic.version = 11 : i64} {
  func.func @_net_kernel(%arg0: i32, %arg1: memref<8x4xf32, #tpu.memory_space<vmem>>, %arg2: memref<4x32xf32, #tpu.memory_space<vmem>>, %arg3: memref<1x32xf32, #tpu.memory_space<vmem>>, %arg4: memref<32x16xf32, #tpu.memory_space<vmem>>, %arg5: memref<1x16xf32, #tpu.memory_space<vmem>>, %arg6: memref<1x128xf32, #tpu.memory_space<vmem>>, %arg7: memref<20x128xf32, #tpu.memory_space<vmem>>, %arg8: memref<8x128xf32, #tpu.memory_space<vmem>>, %arg9: memref<8x128xf32, #tpu.memory_space<vmem>>) attributes {dimension_semantics = [#tpu.dimension_semantics<parallel>], iteration_bounds = array<i64: 2>, scalar_prefetch = 0 : i64, scratch_operands = 0 : i64, tpu.core_type = #tpu.core_type<tc>, window_params = [{transform_indices = @transform_0, window_bounds = array<i64: 8, 4>}, {pipeline_mode = #tpu.pipeline_mode<synchronous>, transform_indices = @transform_1, window_bounds = array<i64: 4, 32>}, {pipeline_mode = #tpu.pipeline_mode<synchronous>, transform_indices = @transform_2, window_bounds = array<i64: 1, 32>}, {pipeline_mode = #tpu.pipeline_mode<synchronous>, transform_indices = @transform_3, window_bounds = array<i64: 32, 16>}, {pipeline_mode = #tpu.pipeline_mode<synchronous>, transform_indices = @transform_4, window_bounds = array<i64: 1, 16>}, {pipeline_mode = #tpu.pipeline_mode<synchronous>, transform_indices = @transform_5, window_bounds = array<i64: 1, 128>}, {pipeline_mode = #tpu.pipeline_mode<synchronous>, transform_indices = @transform_6, window_bounds = array<i64: 20, 128>}, {transform_indices = @transform_7, window_bounds = array<i64: 8, 128>}, {transform_indices = @transform_8, window_bounds = array<i64: 8, 128>}]} {
    %c0 = arith.constant 0 : index
    %c0_0 = arith.constant 0 : index
    %0 = vector.load %arg1[%c0, %c0_0] : memref<8x4xf32, #tpu.memory_space<vmem>>, vector<8x4xf32>
    %c0_1 = arith.constant 0 : index
    %c0_2 = arith.constant 0 : index
    %1 = vector.load %arg2[%c0_1, %c0_2] : memref<4x32xf32, #tpu.memory_space<vmem>>, vector<4x32xf32>
    %c0_3 = arith.constant 0 : index
    %c0_4 = arith.constant 0 : index
    %2 = vector.load %arg3[%c0_3, %c0_4] : memref<1x32xf32, #tpu.memory_space<vmem>>, vector<1x32xf32>
    %cst = arith.constant dense<0.000000e+00> : vector<8x32xf32>
    %3 = tpu.matmul %0, %1, %cst {dimension_numbers = #tpu.dot_dimension_numbers<[1], [0], [0], [1], [0, 0, 1, 1], [], []>} : vector<8x4xf32>, vector<4x32xf32>, vector<8x32xf32> -> vector<8x32xf32>
    %4 = vector.broadcast %2 : vector<1x32xf32> to vector<8x32xf32>
    %5 = arith.addf %3, %4 : vector<8x32xf32>
    %cst_5 = arith.constant 0.000000e+00 : f32
    %6 = vector.broadcast %cst_5 : f32 to vector<8x32xf32>
    %7 = arith.maximumf %5, %6 : vector<8x32xf32>
    %c0_6 = arith.constant 0 : index
    %c0_7 = arith.constant 0 : index
    %8 = vector.load %arg4[%c0_6, %c0_7] : memref<32x16xf32, #tpu.memory_space<vmem>>, vector<32x16xf32>
    %c0_8 = arith.constant 0 : index
    %c0_9 = arith.constant 0 : index
    %9 = vector.load %arg5[%c0_8, %c0_9] : memref<1x16xf32, #tpu.memory_space<vmem>>, vector<1x16xf32>
    %cst_10 = arith.constant dense<0.000000e+00> : vector<8x16xf32>
    %10 = tpu.matmul %7, %8, %cst_10 {dimension_numbers = #tpu.dot_dimension_numbers<[1], [0], [0], [1], [0, 0, 1, 1], [], []>} : vector<8x32xf32>, vector<32x16xf32>, vector<8x16xf32> -> vector<8x16xf32>
    %11 = vector.broadcast %9 : vector<1x16xf32> to vector<8x16xf32>
    %12 = arith.addf %10, %11 : vector<8x16xf32>
    %cst_11 = arith.constant 0.000000e+00 : f32
    %13 = vector.broadcast %cst_11 : f32 to vector<8x16xf32>
    %14 = arith.maximumf %12, %13 : vector<8x16xf32>
    %15 = tpu.concatenate %0, %14 in 1 : vector<8x4xf32>, vector<8x16xf32> -> vector<8x20xf32>
    %c0_12 = arith.constant 0 : index
    %c0_13 = arith.constant 0 : index
    %16 = vector.load %arg6[%c0_12, %c0_13] : memref<1x128xf32, #tpu.memory_space<vmem>>, vector<1x128xf32>
    %c0_14 = arith.constant 0 : index
    %c0_15 = arith.constant 0 : index
    %17 = vector.load %arg7[%c0_14, %c0_15] : memref<20x128xf32, #tpu.memory_space<vmem>>, vector<20x128xf32>
    %cst_16 = arith.constant dense<0.000000e+00> : vector<8x128xf32>
    %18 = tpu.matmul %15, %17, %cst_16 {dimension_numbers = #tpu.dot_dimension_numbers<[1], [0], [0], [1], [0, 0, 1, 1], [], []>} : vector<8x20xf32>, vector<20x128xf32>, vector<8x128xf32> -> vector<8x128xf32>
    %19 = vector.broadcast %16 : vector<1x128xf32> to vector<8x128xf32>
    %20 = arith.addf %19, %18 : vector<8x128xf32>
    %c0_17 = arith.constant 0 : index
    %c0_18 = arith.constant 0 : index
    %21 = vector.load %arg8[%c0_17, %c0_18] : memref<8x128xf32, #tpu.memory_space<vmem>>, vector<8x128xf32>
    tpu.vector_store %arg8[%c0_17, %c0_18], %20 {strides = array<i32>} : memref<8x128xf32, #tpu.memory_space<vmem>>, vector<8x128xf32>,
    %cst_19 = arith.constant 1.000000e+00 : f32
    %22 = vector.broadcast %cst_19 : f32 to vector<8x1xf32>
    %cst_20 = arith.constant 0.000000e+00 : f32
    %23 = vector.broadcast %cst_20 : f32 to vector<8x107xf32>
    %24 = tpu.concatenate %22, %15, %23 in 1 : vector<8x1xf32>, vector<8x20xf32>, vector<8x107xf32> -> vector<8x128xf32>
    %c0_21 = arith.constant 0 : index
    %c0_22 = arith.constant 0 : index
    %25 = vector.load %arg9[%c0_21, %c0_22] : memref<8x128xf32, #tpu.memory_space<vmem>>, vector<8x128xf32>
    tpu.vector_store %arg9[%c0_21, %c0_22], %24 {strides = array<i32>} : memref<8x128xf32, #tpu.memory_space<vmem>>, vector<8x128xf32>,
    return
  }
  func.func @transform_0(%arg0: i32) -> (i32, i32) {
    %c0_i32 = arith.constant 0 : i32
    %c0_i32_0 = arith.constant 0 : i32
    return %arg0, %c0_i32 : i32, i32
  }
  func.func @transform_1(%arg0: i32) -> (i32, i32) {
    %c0_i32 = arith.constant 0 : i32
    %c0_i32_0 = arith.constant 0 : i32
    %c0_i32_1 = arith.constant 0 : i32
    return %c0_i32, %c0_i32_0 : i32, i32
  }
  func.func @transform_2(%arg0: i32) -> (i32, i32) {
    %c0_i32 = arith.constant 0 : i32
    %c0_i32_0 = arith.constant 0 : i32
    %c0_i32_1 = arith.constant 0 : i32
    return %c0_i32, %c0_i32_0 : i32, i32
  }
  func.func @transform_3(%arg0: i32) -> (i32, i32) {
    %c0_i32 = arith.constant 0 : i32
    %c0_i32_0 = arith.constant 0 : i32
    %c0_i32_1 = arith.constant 0 : i32
    return %c0_i32, %c0_i32_0 : i32, i32
  }
  func.func @transform_4(%arg0: i32) -> (i32, i32) {
    %c0_i32 = arith.constant 0 : i32
    %c0_i32_0 = arith.constant 0 : i32
    %c0_i32_1 = arith.constant 0 : i32
    return %c0_i32, %c0_i32_0 : i32, i32
  }
  func.func @transform_5(%arg0: i32) -> (i32, i32) {
    %c0_i32 = arith.constant 0 : i32
    %c0_i32_0 = arith.constant 0 : i32
    %c0_i32_1 = arith.constant 0 : i32
    return %c0_i32, %c0_i32_0 : i32, i32
  }
  func.func @transform_6(%arg0: i32) -> (i32, i32) {
    %c0_i32 = arith.constant 0 : i32
    %c0_i32_0 = arith.constant 0 : i32
    %c0_i32_1 = arith.constant 0 : i32
    return %c0_i32, %c0_i32_0 : i32, i32
  }
  func.func @transform_7(%arg0: i32) -> (i32, i32) {
    %c0_i32 = arith.constant 0 : i32
    %c0_i32_0 = arith.constant 0 : i32
    return %arg0, %c0_i32 : i32, i32
  }
  func.func @transform_8(%arg0: i32) -> (i32, i32) {
    %c0_i32 = arith.constant 0 : i32
    %c0_i32_0 = arith.constant 0 : i32
    return %arg0, %c0_i32 : i32, i32
  }
}

</mosaic_0001>

<bundles_post_ra>
// kernel: tpu_custom_call.1
= control target key start
LH: loop header
LB: loop body
LE: loop exit
PB: predicated region body
PF: predicated region fallthrough
CT: control target
= control target key end

     0   :  { %14 = vsyncpa [#allocation3], 0  ;;  %s1155_s0 = inlined_call_operand.vmem [shape: f32[16,4], index: 0, kind: input, shape index: {}]   ;;  %s1156_s1 = inlined_call_operand.vmem [shape: f32[4,32], index: 1, kind: input, shape index: {}]   ;;  %s1157_s2 = inlined_call_operand.vmem [shape: f32[1,32], index: 2, kind: input, shape index: {}]   ;;  %s1158_s3 = inlined_call_operand.vmem [shape: f32[32,16], index: 3, kind: input, shape index: {}]   ;;  %s1159_s4 = inlined_call_operand.vmem [shape: f32[1,16], index: 4, kind: input, shape index: {}]   ;;  %s1160_s5 = inlined_call_operand.vmem [shape: f32[1,128], index: 5, kind: input, shape index: {}]   ;;  %s1161_s6 = inlined_call_operand.vmem [shape: f32[20,128], index: 6, kind: input, shape index: {}]   ;;  %s1162_s7 = inlined_call_operand.hbm [shape: f32[16,128], index: 7, kind: output, shape index: {0}]   ;;  %s1163_s8 = inlined_call_operand.hbm [shape: f32[16,128], index: 8, kind: output, shape index: {1}]  }
   0x1   :  { %16 = vsyncpa [#allocation3 + $0x1], 0 }
   0x2   :  { %17 = vsyncpa [#allocation5], 0 }
   0x3   :  { %19 = vsyncpa [#allocation5 + $0x1], 0  ;;  %s974_s27 = smov 0   ;;  %s976_s28 = smov 0  }
   0x4   :  { %s978_s29 = smov 0   ;;  %s980_s30 = smov 0  }
   0x5 LB: > { %s995_s9 = sadd.s32 4294967295, %s920_s30   ;;  %s711_s10 = sadd.s32 4294967294, %s920_s30   ;;  %s920_s30 = sphi %s980_s30, %s1171_s30   ;;  %s916_s29 = sphi %s978_s29, %s1170_s29   ;;  %s912_s28 = sphi %s976_s28, %s1169_s28   ;;  %s908_s27 = sphi %s974_s27, %s1168_s27  }
   0x6   : > { %s999_s11 = sadd.s32 1, %s920_s30   ;;  %s184_s12 = sadd.s32 1, %s916_s29 }
   0x7   : > { %s181_s13 = ssub.s32 %s920_s30, %s999_s11  ;;  %p194_p0 = scmp.ne.s32.totalorder %s916_s29, %s912_s28 }
   0x8   : > { %p182_p1 = scmp.eq.s32.totalorder %s181_s13, 0  ;;  %p195_p2 = scmp.eq.s32.totalorder %s995_s9, 1 }
   0x9   : > { %p200_p3 = scmp.ne.s32.totalorder %s912_s28, %s908_s27  ;;  %p201_p4 = scmp.eq.s32.totalorder %s711_s10, 1 }
   0xa   : > { %s1010_s14 = scalar_select %p182_p1, %s916_s29, %s184_s12  }
   0xb   : > { %p1012_p5 = por %p195_p2, %p194_p0  ;;  %p1016_p6 = por %p201_p4, %p200_p3 }
   0xc   : > { %p714_p7 = scmp.ge.s32.totalorder %s920_s30, 1  ;;  %p270_p8 = scmp.lt.s32.totalorder %s920_s30, 3 }
   0xe   : > { %p271_p9 = pnand %p714_p7, %p270_p8 }
   0xf   : > { %v313_v0 = vld [vmem:[%s1156_s1] sm:$0xf] (!%p271_p9)  ;;  %vm325_vm0 = vcmask (!%p271_p9), 1043456   ;;  %p308_p10 = scmp.lt.s32.totalorder (!%p271_p9), %s995_s9, 1  ;;  %v922_v1 = vmov (!%p271_p9), 0.0   ;;  %vm923_vm1 = vmmov (!%p271_p9), 0  }
  0x10   : > { %274 = sbr.rel (%p271_p9) target bundleno = 804 (0x324), region = 48  ;;  %743 = vmatprep.subr.mxu0 (!%p271_p9), %v922_v1  ;;  %745 = vmatprep.mubr.msk.f32.mxu0 (!%p271_p9), %vm923_vm1, %v922_v1  ;;  %v400_v2 = vld [vmem:[%s1158_s3] sm:$0xff] (!%p271_p9)  ;;  %v401_v3 = vld [vmem:[%s1158_s3 + $0x8] sm:$0xff] (!%p271_p9)  ;;  %v924_v4 = vmov (!%p271_p9), 0.0|0.0   ;;  %vm321_vm2 = vcmask (!%p271_p9), 31744   ;;  %v402_v7 = vld [vmem:[%s1158_s3 + $0x10] sm:$0xff] (!%p271_p9) }
  0x11   : > { %744 = vmatpush3.msk.msra.mxu0 (!%p271_p9), %vm325_vm0, %v313_v0  ;;  %768 = vmatprep.subr.bf16.mxu1 (!%p271_p9), %v924_v4  ;;  %v769_v5 = vpack.c.bf16 (!%p271_p9), %v401_v3, %v400_v2  ;;  %v403_v8 = vld [vmem:[%s1158_s3 + $0x18] sm:$0xff] (!%p271_p9)  ;;  %v718_v10 = vld [vmem:[%s1157_s2] ss:$0 sm:$0xff] (!%p271_p9)  ;;  %vm411_vm3 = vcmask (!%p271_p9), 261120   ;;  %v493_v16 = vld [vmem:[%s1161_s6 + $0x8] sm:$0xff] (!%p271_p9)  ;;  %s925_s13 = smov (!%p271_p9), 4  }
  0x12   : > { %756 = vmatprep.mubr.msk.f32.mxu1 (!%p271_p9), %vm923_vm1, %v922_v1  ;;  %774 = vmatprep.subr.bf16.mxu0 (!%p271_p9), %v924_v4  ;;  %v772_v9 = vpack.c.bf16 (!%p271_p9), %v403_v8, %v402_v7  ;;  %v492_v15 = vld [vmem:[%s1161_s6] sm:$0xff] (!%p271_p9)  ;;  %v494_v18 = vld [vmem:[%s1161_s6 + $0x10] sm:$0xf] (!%p271_p9)  ;;  %vm495_vm4 = vcmask (!%p271_p9), 162816   ;;  %s926_s17 = smov (!%p271_p9), 1   ;;  %s1065_s18 = sand.u32 (!%p271_p9), 1, %s912_s28  }
  0x13   : > { %770 = vmatpush3.bf16.msra.mxu1 (!%p271_p9), %v769_v5  ;;  %v775_v17 = vpack.c.bf16 (!%p271_p9), %v493_v16, %v492_v15  ;;  %v721_v19 = vld [vmem:[%s1159_s4] ss:$0 sm:$0xff] (!%p271_p9)  ;;  %s715_s19 = sshll.u32 (!%p271_p9), %s1065_s18, 3  ;;  %vm583_vm5 = vcmask (!%p271_p9), 7168   ;;  %s1164_s20 = sshll.u32 (!%p271_p9), %s995_s9, 7  ;;  %vm585_vm6 = vcmask (!%p271_p9), 171008  }
  0x14   : > { %771 = vmatprep.subr.bf16.mxu1 (!%p271_p9), %v924_v4  ;;  %s307_s21 = scalar_lea.vmem (!%p271_p9), [#allocation4], %s715_s19  ;;  %s1076_s25 = scalar_lea.hbm (!%p271_p9), %s1163_s8, %s1164_s20 }
  0x15   : > { %s620_s22 = sshll.u32 (!%p271_p9), %s307_s21, 4  ;;  %s594_s26 = scalar_lea.sflag (!%p271_p9), [#allocation5], %s1065_s18  ;;  %s1078_s22 = int_to_ptr.vmem [resolvable:$true] %s620_s22 }
  0x16   : > { %s927_s12 = smov (!%p271_p9), [#allocation4]  }
  0x17   : > { %s309_s23 = scalar_select %p308_p10, %s995_s9, 1  ;;  %773 = vmatpush3.bf16.msra.mxu1 %v772_v9 }
  0x19   : > { %s717_s24 = sshll.u32 %s309_s23, 3 }
  0x1a   : > { %s311_s10 = scalar_lea.vmem %s1155_s0, %s717_s24 }
  0x1b   : > { %v312_v6 = vld [vmem:[%s311_s10] sm:$0xff]  ;;  %s826_s10 = scalar_lea.vmem %s1078_s22, 128 }
  0x1c   : > { %746 = vmatmul.mubr.msk.f32.vlgmr.msra.gmra.mrb[0].mxu0 %vm321_vm2, %v312_v6  ;;  %p827_p11 = scmp.ne.s32.totalorder %s1078_s22, %s826_s10 }
  0x1d   : > { %765 = vmatprep.mubr.msk.f32.mxu0 %vm923_vm1, %v922_v1  ;;  %776 = vmatpush3.bf16.msra.mxu0 %v775_v17 }
  0x1e   : > { %763 = vmatprep.subr.mxu0 %v922_v1  ;;  %p828_p12 = pnand %p827_p11, %p1012_p5 }
  0x20   : > { %p829_p13 = pneg %p828_p12 }
  0x21   : > { %764 = vmatpush3.msk.msra.mxu0 %vm325_vm0, %v494_v18 }
  0xef   : > { %v395_v11 = vpop.f32.mrb[0].mxu0 }
  0xf0   : > { %v396_v12 = vadd.f32 %v718_v10, %v395_v11  ;;  %v747_v13 = vpop.f32.mrb[1].mxu0 }
  0xf2   : > { %v399_v14 = vmax.f32 %v396_v12, 0.0 }
  0xf4   : > { %757 = vmatmul.mubr.msk.f32.vlgmr.msra.gmra.mrb[0].mxu1 %vm411_vm3, %v399_v14 }
 0x1c7   : > { %v481_v20 = vpop.f32.mrb[0].mxu1 }
 0x1c8   : > { %v482_v21 = vadd.f32 %v721_v19, %v481_v20  ;;  %v758_v22 = vpop.f32.mrb[1].mxu1 }
 0x1ca   : > { %v485_v23 = vmax.f32 %v482_v21, 0.0 }
 0x1cc   : > { %487 = vrot.lane.b32.xlu0 %v485_v23, %s925_s13  ;;  %s830_s13 = sshll.u32 %s927_s12, 4  ;;  %s831_s13 = int_to_ptr.vmem [resolvable:$false] %s830_s13 }
 0x1cd   : > { %p833_p0 = scmp.lt.s32.totalorder %s1078_s22, %s831_s13 }
 0x23e   : > { %v488_v24 = vpop.permute.xlu0 %487 }
 0x23f   : > { %v490_v25 = vsel %vm321_vm2, %v312_v6, %v488_v24 }
 0x240   : > { %580 = vrot.lane.b32.xlu0 %v490_v25, %s926_s17  ;;  %766 = vmatmul.mubr.msk.f32.vlgmr.msra.gmra.mrb[2].mxu0 %vm495_vm4, %v490_v25  ;;  %s832_s17 = scalar_lea.vmem %s831_s13, 256 }
 0x241   : > { %p834_p1 = scmp.lt.s32.totalorder %s832_s17, %s826_s10 }
 0x243   : > { %p835_p2 = por %p834_p1, %p833_p0 }
 0x245   : > { %p836_p3 = pnand %p835_p2, %p829_p13 }
 0x2b2   : > { %v581_v26 = vpop.permute.xlu0 %580 }
 0x2b3   : > { %v584_v27 = vsel %vm583_vm5, 1.0, %v581_v26 }
 0x2b4   : > { %v586_v28 = vsel %vm585_vm6, %v584_v27, 0.0 }
 0x2b5   : > { %587 = vst [vmem:[%s307_s21] sm:$0xff] %v586_v28 }
 0x2b6   : > { %839 = shalt.err (!%p836_p3)
}
 0x2b7   : > { %s840_s21 = scalar_lea.hbm %s1076_s25, 128  ;;  %s844_s12 = scalar_lea.hbm %s1163_s8, 256 }
 0x2b8   : > { %p841_p4 = scmp.ne.s32.totalorder %s1076_s25, %s840_s21  ;;  %p845_p9 = scmp.lt.u32.totalorder %s1076_s25, %s1163_s8 }
 0x2b9   : > { %p846_p10 = scmp.lt.u32.totalorder %s844_s12, %s840_s21  ;;  %p848_p12 = scmp.lt.u32.totalorder %s840_s21, %s1076_s25 }
 0x2ba   : > { %p842_p7 = pnand %p841_p4, %p1012_p5 }
 0x2bb   : > { %p847_p11 = por %p846_p10, %p845_p9 }
 0x2bc   : > { %p843_p8 = pneg %p842_p7 }
 0x2bd   : > { %p849_p13 = por %p848_p12, %p847_p11 }
 0x2bf   : > { %p850_p0 = pnand %p849_p13, %p843_p8 }
 0x2c1   : > { %853 = shalt.err (!%p850_p0)
}
 0x2c2   : > { %778 = dma.vmem_to_hbm [thread:$0]  (%p1012_p5), %s1078_s22, 128, %s1076_s25, %s594_s26   ;;  %v725_v29 = vld [vmem:[%s1160_s5] ss:$0 sm:$0xff] }
 0x2c3   : > { %s300_s20 = scalar_lea.vmem [#allocation2], %s715_s19  ;;  %s1167_s21 = sshll.u32 %s995_s9, 7 }
 0x2c4   : > { %s607_s23 = sshll.u32 %s300_s20, 4  ;;  %s1112_s13 = scalar_lea.hbm %s1162_s7, %s1167_s21  ;;  %s1114_s23 = int_to_ptr.vmem [resolvable:$true] %s607_s23 }
 0x2c5   : > { %s589_s22 = scalar_lea.sflag [#allocation3], %s1065_s18  ;;  %s854_s25 = scalar_lea.vmem %s1114_s23, 128 }
 0x2c6   : > { %p855_p1 = scmp.ne.s32.totalorder %s1114_s23, %s854_s25  ;;  %s928_s19 = smov [#allocation2]  }
 0x2c7   : > { %s858_s26 = sshll.u32 %s928_s19, 4  ;;  %s859_s26 = int_to_ptr.vmem [resolvable:$false] %s858_s26 }
 0x2c8   : > { %p856_p2 = pnand %p855_p1, %p1012_p5  ;;  %s860_s9 = scalar_lea.vmem %s859_s26, 256 }
 0x2c9   : > { %p861_p4 = scmp.lt.s32.totalorder %s1114_s23, %s859_s26  ;;  %p862_p7 = scmp.lt.s32.totalorder %s860_s9, %s854_s25 }
 0x2ca   : > { %p857_p3 = pneg %p856_p2 }
 0x2cb   : > { %p863_p8 = por %p862_p7, %p861_p4 }
 0x2cd   : > { %p864_p9 = pnand %p863_p8, %p857_p3 }
 0x313   : > { %v568_v30 = vpop.f32.mrb[2].mxu0 }
 0x314   : > { %v578_v31 = vadd.f32 %v725_v29, %v568_v30  ;;  %v767_v32 = vpop.f32.mrb[3].mxu0 }
 0x316   : > { %579 = vst [vmem:[%s300_s20] sm:$0xff] %v578_v31 }
 0x317   : > { %867 = shalt.err (!%p864_p9)
}
 0x318   : > { %s868_s18 = scalar_lea.hbm %s1112_s13, 128  ;;  %s872_s20 = scalar_lea.hbm %s1162_s7, 256 }
 0x319   : > { %p869_p10 = scmp.ne.s32.totalorder %s1112_s13, %s868_s18  ;;  %p873_p13 = scmp.lt.u32.totalorder %s1112_s13, %s1162_s7 }
 0x31a   : > { %p874_p0 = scmp.lt.u32.totalorder %s872_s20, %s868_s18  ;;  %p876_p2 = scmp.lt.u32.totalorder %s868_s18, %s1112_s13 }
 0x31b   : > { %p870_p11 = pnand %p869_p10, %p1012_p5 }
 0x31c   : > { %p875_p1 = por %p874_p0, %p873_p13 }
 0x31d   : > { %p871_p12 = pneg %p870_p11 }
 0x31e   : > { %p877_p3 = por %p876_p2, %p875_p1 }
 0x320   : > { %p878_p4 = pnand %p877_p3, %p871_p12 }
 0x322   : > { %881 = shalt.err (!%p878_p4)
}
 0x323   : > { %777 = dma.vmem_to_hbm [thread:$0]  (%p1012_p5), %s1114_s23, 128, %s1112_s13, %s589_s22  }
 0x324 PF: > { %p788_p7 = scmp.ge.s32.totalorder %s920_s30, 2  ;;  %s632_s12 = sand.u32 1, %s908_s27  }
 0x325   : > { %s633_s25 = scalar_lea.sflag [#allocation3], %s632_s12 }
 0x326   : > { %p782_p8 = pnand %p788_p7, %p1016_p6 }
 0x328   : > { %899 = dma.done.wait (!%p782_p8), %s633_s25, 128  }
 0x329   : > { %901 = vsyncadd (!%p782_p8), %s633_s25, 4294967168  ;;  %s642_s19 = scalar_lea.sflag [#allocation5], %s632_s12 }
 0x32a   : > { %903 = dma.done.wait (!%p782_p8), %s642_s19, 128  }
 0x32b   : > { %905 = vsyncadd (!%p782_p8), %s642_s19, 4294967168  ;;  %p22_p5 = scmp.ge.s32.totalorder %s999_s11, 4   ;;  %s1168_s27 = smov %s912_s28 }
 0x32c   : > { %s1169_s28 = smov %s916_s29  ;;  %s1170_s29 = smov %s1010_s14 }
 0x32d   : > { %s1171_s30 = smov %s999_s11  ;;  %24 = sbr.rel (!%p22_p5) target bundleno = 5 (0x5), region = 100 }
 0x334   :  { %647 = vsyncpa [#allocation3], 1 }
 0x335   :  { %649 = vsyncpa [#allocation3 + $0x1], 1 }
 0x336   :  { %650 = vsyncpa [#allocation5], 1 }
 0x337   :  { %652 = vsyncpa [#allocation5 + $0x1], 1 }

</bundles_post_ra>
